<compile_context>
chip_gen: v6e
topology: v6e:2x2x1
jax: 0.10.0
libtpu: 0.0.40
codegen_flags: <defaults>
</compile_context>

<pallas_src>
import jax
import jax.numpy as jnp
from jax.experimental import pallas as pl
from jax.experimental.pallas import tpu as pltpu

LANE = 128  # lane-dense padded width for all operands


def _round_up(x, m):
    return (x + m - 1) // m * m


def net_kernel(x_ref, w1_ref, b1_ref, w2_ref, b2_ref, w3_ref, b3_ref, out_ref):
    # x_ref: (TILE_B, 128)   w*: (128, 128)   b*: (1, 128)   out: (TILE_B, 128)
    x = x_ref[...]

    # conv-as-matmul (full-window conv) + bias + ReLU
    h1 = jnp.dot(x, w1_ref[...], preferred_element_type=jnp.float32) + b1_ref[...]
    h1 = jnp.maximum(h1, 0.0)

    # f1 + ReLU
    h2 = jnp.dot(h1, w2_ref[...], preferred_element_type=jnp.float32) + b2_ref[...]
    h2 = jnp.maximum(h2, 0.0)

    # f2 (action head) -- lane-dense unmasked store, valid columns are [:4]
    out_ref[...] = (
        jnp.dot(h2, w3_ref[...], preferred_element_type=jnp.float32) + b3_ref[...]
    )


def net_forward(x_nchw, padded_params, *, tile_b=1024):
    """x_nchw: (B, 3, 5, 5) float32 -> (B, 4) float32"""
    B = x_nchw.shape[0]
    # Flatten exactly like the conv window sees it: (C, KH, KW) row-major.
    x_flat = x_nchw.reshape(B, -1).astype(jnp.float32)  # (B, 75)
    feat = x_flat.shape[1]

    w1, b1, w2, b2, w3, b3 = padded_params

    # Batch tile: multiple of 8 sublanes, capped at tile_b; pad B up to it.
    tile = min(tile_b, _round_up(B, 8))
    B_pad = _round_up(B, tile)
    x_pad = jnp.pad(x_flat, ((0, B_pad - B), (0, LANE - feat)))  # (B_pad, 128)

    grid = (B_pad // tile,)

    # Advisory cost for XLA's scheduler: three (B,128)x(128,128) matmuls.
    cost = pl.CostEstimate(
        flops=2 * 3 * B_pad * LANE * LANE,
        transcendentals=0,
        bytes_accessed=4 * (2 * B_pad * LANE + 3 * LANE * LANE + 3 * LANE),
    )

    out_padded = pl.pallas_call(
        net_kernel,
        out_shape=jax.ShapeDtypeStruct((B_pad, LANE), jnp.float32),
        grid=grid,
        in_specs=[
            # batch-tiled activations: double-buffered across the grid
            pl.BlockSpec((tile, LANE), lambda i: (i, 0)),
            # weights/biases: constant block index -> resident in VMEM
            pl.BlockSpec((LANE, LANE), lambda i: (0, 0)),
            pl.BlockSpec((1, LANE), lambda i: (0, 0)),
            pl.BlockSpec((LANE, LANE), lambda i: (0, 0)),
            pl.BlockSpec((1, LANE), lambda i: (0, 0)),
            pl.BlockSpec((LANE, LANE), lambda i: (0, 0)),
            pl.BlockSpec((1, LANE), lambda i: (0, 0)),
        ],
        out_specs=pl.BlockSpec((tile, LANE), lambda i: (i, 0)),
        compiler_params=pltpu.CompilerParams(
            dimension_semantics=("parallel",),
        ),
        cost_estimate=cost,
    )(x_pad, w1, b1, w2, b2, w3, b3)

    # Slice away batch padding and the 124 zero lanes of the action head.
    return out_padded[:B, :4]


def init_params(key):
    """Deterministic synthetic parameters matching the PyTorch module shapes."""
    k = jax.random.split(key, 6)
    # Conv2d(3, 25, 5): weight (25, 3, 5, 5), bias (25,)
    conv_w = jax.random.normal(k[0], (25, 3, 5, 5), jnp.float32) * 0.1
    conv_b = jax.random.normal(k[1], (25,), jnp.float32) * 0.1
    # Linear(25, 16): weight (16, 25), bias (16,)  -- PyTorch stores (out, in)
    f1_w = jax.random.normal(k[2], (16, 25), jnp.float32) * 0.1
    f1_b = jax.random.normal(k[3], (16,), jnp.float32) * 0.1
    # Linear(16, 4): weight (4, 16), bias (4,)
    f2_w = jax.random.normal(k[4], (4, 16), jnp.float32) * 0.1
    f2_b = jax.random.normal(k[5], (4,), jnp.float32) * 0.1
    return conv_w, conv_b, f1_w, f1_b, f2_w, f2_b


def pad_params(raw_params):
    """Pre-arrange for right-multiplication and zero-pad to lane-dense shapes."""
    conv_w, conv_b, f1_w, f1_b, f2_w, f2_b = raw_params

    def pad2(a, rows, cols):
        return jnp.pad(a, ((0, rows - a.shape[0]), (0, cols - a.shape[1])))

    w1 = pad2(conv_w.reshape(25, 75).T, LANE, LANE)  # (75, 25) -> (128, 128)
    b1 = pad2(conv_b.reshape(1, 25), 1, LANE)        # (1, 128), pads are 0
    w2 = pad2(f1_w.T, LANE, LANE)                    # (25, 16) -> (128, 128)
    b2 = pad2(f1_b.reshape(1, 16), 1, LANE)
    w3 = pad2(f2_w.T, LANE, LANE)                    # (16, 4)  -> (128, 128)
    b3 = pad2(f2_b.reshape(1, 4), 1, LANE)
    return (w1, b1, w2, b2, w3, b3)


def reference_forward(x_nchw, raw_params):
    """Pure-JAX reference of the same math on the unpadded parameters."""
    conv_w, conv_b, f1_w, f1_b, f2_w, f2_b = raw_params
    x = x_nchw.reshape(x_nchw.shape[0], -1)          # (B, 75)
    h1 = jnp.maximum(x @ conv_w.reshape(25, 75).T + conv_b, 0.0)
    h2 = jnp.maximum(h1 @ f1_w.T + f1_b, 0.0)
    return h2 @ f2_w.T + f2_b


if __name__ == "__main__":
    key = jax.random.PRNGKey(0)
    pkey, xkey = jax.random.split(key)

    raw_params = init_params(pkey)
    padded_params = pad_params(raw_params)

    # Input consistent with the module: conv(5x5, pad 0) must yield 1x1 so
    # that flatten gives 25 features for Linear(25, 16)  ->  (B, 3, 5, 5).
    x = jax.random.normal(xkey, (2, 3, 5, 5), jnp.float32)

    out = net_forward(x, padded_params)
    out = jax.block_until_ready(out)

    ref = reference_forward(x, raw_params)
    assert out.shape == (2, 4)
    assert jnp.allclose(out, ref, atol=1e-5, rtol=1e-5)

    print("KERNEL_OK")
</pallas_src>

<mosaic_0001>
module attributes {stable_mosaic.version = 11 : i64} {
  func.func @net_kernel(%arg0: i32, %arg1: memref<8x128xf32, #tpu.memory_space<vmem>>, %arg2: memref<128x128xf32, #tpu.memory_space<vmem>>, %arg3: memref<1x128xf32, #tpu.memory_space<vmem>>, %arg4: memref<128x128xf32, #tpu.memory_space<vmem>>, %arg5: memref<1x128xf32, #tpu.memory_space<vmem>>, %arg6: memref<128x128xf32, #tpu.memory_space<vmem>>, %arg7: memref<1x128xf32, #tpu.memory_space<vmem>>, %arg8: memref<8x128xf32, #tpu.memory_space<vmem>>) attributes {dimension_semantics = [#tpu.dimension_semantics<parallel>], iteration_bounds = array<i64: 1>, scalar_prefetch = 0 : i64, scratch_operands = 0 : i64, tpu.core_type = #tpu.core_type<tc>, window_params = [{transform_indices = @transform_0, window_bounds = array<i64: 8, 128>}, {pipeline_mode = #tpu.pipeline_mode<synchronous>, transform_indices = @transform_1, window_bounds = array<i64: 128, 128>}, {pipeline_mode = #tpu.pipeline_mode<synchronous>, transform_indices = @transform_2, window_bounds = array<i64: 1, 128>}, {pipeline_mode = #tpu.pipeline_mode<synchronous>, transform_indices = @transform_3, window_bounds = array<i64: 128, 128>}, {pipeline_mode = #tpu.pipeline_mode<synchronous>, transform_indices = @transform_4, window_bounds = array<i64: 1, 128>}, {pipeline_mode = #tpu.pipeline_mode<synchronous>, transform_indices = @transform_5, window_bounds = array<i64: 128, 128>}, {pipeline_mode = #tpu.pipeline_mode<synchronous>, transform_indices = @transform_6, window_bounds = array<i64: 1, 128>}, {transform_indices = @transform_7, window_bounds = array<i64: 8, 128>}]} {
    %c0 = arith.constant 0 : index
    %c0_0 = arith.constant 0 : index
    %0 = vector.load %arg1[%c0, %c0_0] : memref<8x128xf32, #tpu.memory_space<vmem>>, vector<8x128xf32>
    %c0_1 = arith.constant 0 : index
    %c0_2 = arith.constant 0 : index
    %1 = vector.load %arg2[%c0_1, %c0_2] : memref<128x128xf32, #tpu.memory_space<vmem>>, vector<128x128xf32>
    %cst = arith.constant dense<0.000000e+00> : vector<8x128xf32>
    %2 = tpu.matmul %0, %1, %cst {dimension_numbers = #tpu.dot_dimension_numbers<[1], [0], [0], [1], [0, 0, 1, 1], [], []>} : vector<8x128xf32>, vector<128x128xf32>, vector<8x128xf32> -> vector<8x128xf32>
    %c0_3 = arith.constant 0 : index
    %c0_4 = arith.constant 0 : index
    %3 = vector.load %arg3[%c0_3, %c0_4] : memref<1x128xf32, #tpu.memory_space<vmem>>, vector<1x128xf32>
    %4 = vector.broadcast %3 : vector<1x128xf32> to vector<8x128xf32>
    %5 = arith.addf %2, %4 : vector<8x128xf32>
    %cst_5 = arith.constant 0.000000e+00 : f32
    %6 = vector.broadcast %cst_5 : f32 to vector<8x128xf32>
    %7 = arith.maximumf %5, %6 : vector<8x128xf32>
    %c0_6 = arith.constant 0 : index
    %c0_7 = arith.constant 0 : index
    %8 = vector.load %arg4[%c0_6, %c0_7] : memref<128x128xf32, #tpu.memory_space<vmem>>, vector<128x128xf32>
    %cst_8 = arith.constant dense<0.000000e+00> : vector<8x128xf32>
    %9 = tpu.matmul %7, %8, %cst_8 {dimension_numbers = #tpu.dot_dimension_numbers<[1], [0], [0], [1], [0, 0, 1, 1], [], []>} : vector<8x128xf32>, vector<128x128xf32>, vector<8x128xf32> -> vector<8x128xf32>
    %c0_9 = arith.constant 0 : index
    %c0_10 = arith.constant 0 : index
    %10 = vector.load %arg5[%c0_9, %c0_10] : memref<1x128xf32, #tpu.memory_space<vmem>>, vector<1x128xf32>
    %11 = vector.broadcast %10 : vector<1x128xf32> to vector<8x128xf32>
    %12 = arith.addf %9, %11 : vector<8x128xf32>
    %cst_11 = arith.constant 0.000000e+00 : f32
    %13 = vector.broadcast %cst_11 : f32 to vector<8x128xf32>
    %14 = arith.maximumf %12, %13 : vector<8x128xf32>
    %c0_12 = arith.constant 0 : index
    %c0_13 = arith.constant 0 : index
    %15 = vector.load %arg6[%c0_12, %c0_13] : memref<128x128xf32, #tpu.memory_space<vmem>>, vector<128x128xf32>
    %cst_14 = arith.constant dense<0.000000e+00> : vector<8x128xf32>
    %16 = tpu.matmul %14, %15, %cst_14 {dimension_numbers = #tpu.dot_dimension_numbers<[1], [0], [0], [1], [0, 0, 1, 1], [], []>} : vector<8x128xf32>, vector<128x128xf32>, vector<8x128xf32> -> vector<8x128xf32>
    %c0_15 = arith.constant 0 : index
    %c0_16 = arith.constant 0 : index
    %17 = vector.load %arg7[%c0_15, %c0_16] : memref<1x128xf32, #tpu.memory_space<vmem>>, vector<1x128xf32>
    %18 = vector.broadcast %17 : vector<1x128xf32> to vector<8x128xf32>
    %19 = arith.addf %16, %18 : vector<8x128xf32>
    %c0_17 = arith.constant 0 : index
    %c0_18 = arith.constant 0 : index
    %20 = vector.load %arg8[%c0_17, %c0_18] : memref<8x128xf32, #tpu.memory_space<vmem>>, vector<8x128xf32>
    tpu.vector_store %arg8[%c0_17, %c0_18], %19 {strides = array<i32>} : memref<8x128xf32, #tpu.memory_space<vmem>>, vector<8x128xf32>,
    return
  }
  func.func @transform_0(%arg0: i32) -> (i32, i32) {
    %c0_i32 = arith.constant 0 : i32
    %c0_i32_0 = arith.constant 0 : i32
    return %arg0, %c0_i32 : i32, i32
  }
  func.func @transform_1(%arg0: i32) -> (i32, i32) {
    %c0_i32 = arith.constant 0 : i32
    %c0_i32_0 = arith.constant 0 : i32
    %c0_i32_1 = arith.constant 0 : i32
    return %c0_i32, %c0_i32_0 : i32, i32
  }
  func.func @transform_2(%arg0: i32) -> (i32, i32) {
    %c0_i32 = arith.constant 0 : i32
    %c0_i32_0 = arith.constant 0 : i32
    %c0_i32_1 = arith.constant 0 : i32
    return %c0_i32, %c0_i32_0 : i32, i32
  }
  func.func @transform_3(%arg0: i32) -> (i32, i32) {
    %c0_i32 = arith.constant 0 : i32
    %c0_i32_0 = arith.constant 0 : i32
    %c0_i32_1 = arith.constant 0 : i32
    return %c0_i32, %c0_i32_0 : i32, i32
  }
  func.func @transform_4(%arg0: i32) -> (i32, i32) {
    %c0_i32 = arith.constant 0 : i32
    %c0_i32_0 = arith.constant 0 : i32
    %c0_i32_1 = arith.constant 0 : i32
    return %c0_i32, %c0_i32_0 : i32, i32
  }
  func.func @transform_5(%arg0: i32) -> (i32, i32) {
    %c0_i32 = arith.constant 0 : i32
    %c0_i32_0 = arith.constant 0 : i32
    %c0_i32_1 = arith.constant 0 : i32
    return %c0_i32, %c0_i32_0 : i32, i32
  }
  func.func @transform_6(%arg0: i32) -> (i32, i32) {
    %c0_i32 = arith.constant 0 : i32
    %c0_i32_0 = arith.constant 0 : i32
    %c0_i32_1 = arith.constant 0 : i32
    return %c0_i32, %c0_i32_0 : i32, i32
  }
  func.func @transform_7(%arg0: i32) -> (i32, i32) {
    %c0_i32 = arith.constant 0 : i32
    %c0_i32_0 = arith.constant 0 : i32
    return %arg0, %c0_i32 : i32, i32
  }
}

</mosaic_0001>

<bundles_post_ra>
// kernel: tpu_custom_call.1
= control target key start
LH: loop header
LB: loop body
LE: loop exit
PB: predicated region body
PF: predicated region fallthrough
CT: control target
= control target key end

     0   :  { %12 = vsyncpa [#allocation3], 0  ;;  %s792_s0 = inlined_call_operand.hbm [shape: f32[8,128], index: 0, kind: input, shape index: {}]   ;;  %s793_s1 = inlined_call_operand.hbm [shape: f32[128,128], index: 1, kind: input, shape index: {}]   ;;  %s794_s2 = inlined_call_operand.vmem [shape: f32[1,128], index: 2, kind: input, shape index: {}]   ;;  %s795_s3 = inlined_call_operand.hbm [shape: f32[128,128], index: 3, kind: input, shape index: {}]   ;;  %s796_s4 = inlined_call_operand.vmem [shape: f32[1,128], index: 4, kind: input, shape index: {}]   ;;  %s797_s5 = inlined_call_operand.hbm [shape: f32[128,128], index: 5, kind: input, shape index: {}]   ;;  %s798_s6 = inlined_call_operand.vmem [shape: f32[1,128], index: 6, kind: input, shape index: {}]   ;;  %s799_s7 = inlined_call_operand.hbm [shape: f32[8,128], index: 7, kind: output, shape index: {}]  }
   0x1   :  { %13 = vsyncpa [#allocation6], 0 }
   0x2   :  { %14 = vsyncpa [#allocation9], 0 }
   0x3   :  { %15 = vsyncpa [#allocation4], 0  ;;  %s656_s24 = smov [#allocation5]  }
   0x4   :  { %s31_s25 = sshll.u32 %s656_s24, 4  ;;  %s32_s25 = int_to_ptr.vmem [resolvable:$true] %s31_s25 }
   0x5   :  { %s556_s26 = scalar_lea.vmem %s32_s25, 2048  ;;  %p561_p1 = scmp.lt.s32.totalorder %s32_s25, %s32_s25 }
   0x6   :  { %p557_p0 = scmp.ne.s32.totalorder %s32_s25, %s556_s26  ;;  %p562_p2 = scmp.lt.s32.totalorder %s556_s26, %s556_s26 }
   0x8   :  { %p563_p3 = por %p562_p2, %p561_p1 }
   0xa   :  { %p564_p4 = pnand %p563_p3, %p557_p0 }
   0xc   :  { %567 = shalt.err (!%p564_p4)
}
   0xd   :  { %s657_s27 = smov 128   ;;  %s658_s28 = smov 8  }
   0xe   :  { %37 = dma.hbm_to_vmem [thread:$0]  %s793_s1, 2048, %s32_s25, [#allocation6], %s657_s27, %s657_s27, %s658_s28  }
   0xf   :  { %s659_s8 = smov [#allocation2]   ;;  %s660_s10 = smov [#allocation7]  }
  0x10   :  { %s22_s9 = sshll.u32 %s659_s8, 4  ;;  %s45_s11 = sshll.u32 %s660_s10, 4  ;;  %s23_s9 = int_to_ptr.vmem [resolvable:$true] %s22_s9  ;;  %s46_s11 = int_to_ptr.vmem [resolvable:$true] %s45_s11 }
  0x11   :  { %s576_s12 = scalar_lea.vmem %s23_s9, 128  ;;  %p581_p6 = scmp.lt.s32.totalorder %s23_s9, %s23_s9 }
  0x12   :  { %p577_p5 = scmp.ne.s32.totalorder %s23_s9, %s576_s12  ;;  %p582_p7 = scmp.lt.s32.totalorder %s576_s12, %s576_s12 }
  0x14   :  { %p583_p8 = por %p582_p7, %p581_p6 }
  0x16   :  { %p584_p9 = pnand %p583_p8, %p577_p5 }
  0x18   :  { %587 = shalt.err (!%p584_p9)
}
  0x19   :  { %25 = dma.hbm_to_vmem [thread:$0]  %s792_s0, 128, %s23_s9, [#allocation3]  }
  0x1a   :  { %s596_s15 = scalar_lea.vmem %s46_s11, 2048  ;;  %p601_p11 = scmp.lt.s32.totalorder %s46_s11, %s46_s11 }
  0x1b   :  { %p597_p10 = scmp.ne.s32.totalorder %s46_s11, %s596_s15  ;;  %p602_p12 = scmp.lt.s32.totalorder %s596_s15, %s596_s15 }
  0x1d   :  { %p603_p13 = por %p602_p12, %p601_p11 }
  0x1f   :  { %p604_p0 = pnand %p603_p13, %p597_p10 }
  0x21   :  { %607 = shalt.err (!%p604_p0)
}
  0x22   :  { %51 = dma.hbm_to_vmem [thread:$0]  %s795_s3, 2048, %s46_s11, [#allocation6], %s657_s27, %s657_s27, %s658_s28  }
  0x23   :  { %s661_s17 = smov [#allocation8]  }
  0x24   :  { %s59_s18 = sshll.u32 %s661_s17, 4  ;;  %s60_s18 = int_to_ptr.vmem [resolvable:$true] %s59_s18 }
  0x25   :  { %s616_s19 = scalar_lea.vmem %s60_s18, 2048  ;;  %p621_p2 = scmp.lt.s32.totalorder %s60_s18, %s60_s18 }
  0x26   :  { %p617_p1 = scmp.ne.s32.totalorder %s60_s18, %s616_s19  ;;  %p622_p3 = scmp.lt.s32.totalorder %s616_s19, %s616_s19 }
  0x28   :  { %p623_p4 = por %p622_p3, %p621_p2 }
  0x2a   :  { %p624_p5 = pnand %p623_p4, %p617_p1 }
  0x2c   :  { %627 = shalt.err (!%p624_p5)
}
  0x2d   :  { %65 = dma.hbm_to_vmem [thread:$0]  %s797_s5, 2048, %s60_s18, [#allocation9], %s657_s27, %s657_s27, %s658_s28  }
  0x2e   :  { %648 = dma.done.wait [#allocation3], 128  }
  0x2f   :  { %649 = vsyncadd [#allocation3], 4294967168 }
  0x30   :  { %650 = dma.done.wait [#allocation6], 4096  }
  0x31   :  { %651 = vsyncadd [#allocation6], 4294963200 }
  0x32   :  { %652 = dma.done.wait [#allocation9], 2048  }
  0x33   :  { %653 = vsyncadd [#allocation9], 4294965248  ;;  %v662_v0 = vmov 0.0   ;;  %vm663_vm0 = vmmov 0   ;;  %v96_v1 = vld [vmem:[#allocation5 + $0x78] sm:$0xff]  ;;  %v95_v2 = vld [vmem:[#allocation5 + $0x70] sm:$0xff] }
  0x34   :  { %434 = vmatprep.subr.mxu0 %v662_v0  ;;  %466 = vmatprep.mubr.msk.f32.mxu0 %vm663_vm0, %v662_v0  ;;  %v94_v3 = vld [vmem:[#allocation5 + $0x68] sm:$0xff]  ;;  %v93_v4 = vld [vmem:[#allocation5 + $0x60] sm:$0xff]  ;;  %v190_v5 = vld [vmem:[#allocation7 + $0x78] sm:$0xff]  ;;  %s664_s24 = smov [#allocation10]  }
  0x35   :  { %469 = vmatprep.subr.mxu1 %v662_v0  ;;  %501 = vmatprep.mubr.msk.f32.mxu1 %vm663_vm0, %v662_v0  ;;  %v92_v6 = vld [vmem:[#allocation5 + $0x58] sm:$0xff]  ;;  %v189_v7 = vld [vmem:[#allocation7 + $0x70] sm:$0xff]  ;;  %v188_v8 = vld [vmem:[#allocation7 + $0x68] sm:$0xff]  ;;  %s369_s25 = sshll.u32 %s664_s24, 4  ;;  %s370_s25 = int_to_ptr.vmem [resolvable:$true] %s369_s25 }
  0x36   :  { %435 = vmatpush3.msra.mxu0 %v96_v1  ;;  %470 = vmatpush3.msra.mxu1 %v190_v5  ;;  %v91_v9 = vld [vmem:[#allocation5 + $0x50] sm:$0xff]  ;;  %v187_v10 = vld [vmem:[#allocation7 + $0x60] sm:$0xff]  ;;  %v90_v11 = vld [vmem:[#allocation5 + $0x48] sm:$0xff]  ;;  %s628_s26 = scalar_lea.vmem %s370_s25, 128  ;;  %p633_p7 = scmp.lt.s32.totalorder %s370_s25, %s370_s25 }
  0x37   :  { %436 = vmatprep.subr.mxu0 %v662_v0  ;;  %471 = vmatprep.subr.mxu1 %v662_v0  ;;  %v186_v12 = vld [vmem:[#allocation7 + $0x58] sm:$0xff]  ;;  %v89_v13 = vld [vmem:[#allocation5 + $0x40] sm:$0xff]  ;;  %v185_v14 = vld [vmem:[#allocation7 + $0x50] sm:$0xff]  ;;  %p629_p6 = scmp.ne.s32.totalorder %s370_s25, %s628_s26  ;;  %p634_p8 = scmp.lt.s32.totalorder %s628_s26, %s628_s26 }
  0x38   :  { %437 = vmatpush3.msra.mxu0 %v95_v2  ;;  %472 = vmatpush3.msra.mxu1 %v189_v7  ;;  %v88_v15 = vld [vmem:[#allocation5 + $0x38] sm:$0xff]  ;;  %v184_v16 = vld [vmem:[#allocation7 + $0x48] sm:$0xff]  ;;  %v87_v17 = vld [vmem:[#allocation5 + $0x30] sm:$0xff] }
  0x39   :  { %438 = vmatprep.subr.mxu0 %v662_v0  ;;  %473 = vmatprep.subr.mxu1 %v662_v0  ;;  %v183_v18 = vld [vmem:[#allocation7 + $0x40] sm:$0xff]  ;;  %v86_v19 = vld [vmem:[#allocation5 + $0x28] sm:$0xff]  ;;  %v182_v20 = vld [vmem:[#allocation7 + $0x38] sm:$0xff]  ;;  %p635_p9 = por %p634_p8, %p633_p7 }
  0x3a   :  { %439 = vmatpush3.msra.mxu0 %v94_v3  ;;  %474 = vmatpush3.msra.mxu1 %v188_v8  ;;  %v85_v21 = vld [vmem:[#allocation5 + $0x20] sm:$0xff]  ;;  %v181_v22 = vld [vmem:[#allocation7 + $0x30] sm:$0xff]  ;;  %v84_v23 = vld [vmem:[#allocation5 + $0x18] sm:$0xff] }
  0x3b   :  { %440 = vmatprep.subr.mxu0 %v662_v0  ;;  %475 = vmatprep.subr.mxu1 %v662_v0  ;;  %v180_v24 = vld [vmem:[#allocation7 + $0x28] sm:$0xff]  ;;  %v83_v25 = vld [vmem:[#allocation5 + $0x10] sm:$0xff]  ;;  %v179_v26 = vld [vmem:[#allocation7 + $0x20] sm:$0xff]  ;;  %p636_p10 = pnand %p635_p9, %p629_p6 }
  0x3c   :  { %441 = vmatpush3.msra.mxu0 %v93_v4  ;;  %476 = vmatpush3.msra.mxu1 %v187_v10  ;;  %v82_v27 = vld [vmem:[#allocation5 + $0x8] sm:$0xff]  ;;  %v178_v28 = vld [vmem:[#allocation7 + $0x18] sm:$0xff]  ;;  %v81_v29 = vld [vmem:[#allocation5] sm:$0xff] }
  0x3d   :  { %442 = vmatprep.subr.mxu0 %v662_v0  ;;  %477 = vmatprep.subr.mxu1 %v662_v0  ;;  %v80_v30 = vld [vmem:[#allocation2] sm:$0xff]  ;;  %v177_v31 = vld [vmem:[#allocation7 + $0x10] sm:$0xff]  ;;  %v176_v32 = vld [vmem:[#allocation7 + $0x8] sm:$0xff] }
  0x3e   :  { %443 = vmatpush3.msra.mxu0 %v92_v6  ;;  %478 = vmatpush3.msra.mxu1 %v186_v12  ;;  %v175_v33 = vld [vmem:[#allocation7] sm:$0xff]  ;;  %v284_v34 = vld [vmem:[#allocation8 + $0x78] sm:$0xff]  ;;  %v283_v35 = vld [vmem:[#allocation8 + $0x70] sm:$0xff] }
  0x3f   :  { %444 = vmatprep.subr.mxu0 %v662_v0  ;;  %479 = vmatprep.subr.mxu1 %v662_v0  ;;  %v282_v36 = vld [vmem:[#allocation8 + $0x68] sm:$0xff]  ;;  %v281_v37 = vld [vmem:[#allocation8 + $0x60] sm:$0xff]  ;;  %v280_v38 = vld [vmem:[#allocation8 + $0x58] sm:$0xff] }
  0x40   :  { %445 = vmatpush3.msra.mxu0 %v91_v9  ;;  %480 = vmatpush3.msra.mxu1 %v185_v14  ;;  %v279_v39 = vld [vmem:[#allocation8 + $0x50] sm:$0xff]  ;;  %v278_v40 = vld [vmem:[#allocation8 + $0x48] sm:$0xff]  ;;  %v277_v41 = vld [vmem:[#allocation8 + $0x40] sm:$0xff] }
  0x41   :  { %446 = vmatprep.subr.mxu0 %v662_v0  ;;  %481 = vmatprep.subr.mxu1 %v662_v0  ;;  %v276_v42 = vld [vmem:[#allocation8 + $0x38] sm:$0xff]  ;;  %v275_v43 = vld [vmem:[#allocation8 + $0x30] sm:$0xff]  ;;  %v274_v44 = vld [vmem:[#allocation8 + $0x28] sm:$0xff] }
  0x42   :  { %447 = vmatpush3.msra.mxu0 %v90_v11  ;;  %482 = vmatpush3.msra.mxu1 %v184_v16  ;;  %v273_v45 = vld [vmem:[#allocation8 + $0x20] sm:$0xff]  ;;  %v272_v46 = vld [vmem:[#allocation8 + $0x18] sm:$0xff]  ;;  %v271_v52 = vld [vmem:[#allocation8 + $0x10] sm:$0xff] }
  0x43   :  { %448 = vmatprep.subr.mxu0 %v662_v0  ;;  %483 = vmatprep.subr.mxu1 %v662_v0  ;;  %v380_v47 = vld [vmem:[%s794_s2] ss:$0 sm:$0xff]  ;;  %v270_v53 = vld [vmem:[#allocation8 + $0x8] sm:$0xff]  ;;  %v269_v54 = vld [vmem:[#allocation8] sm:$0xff] }
  0x44   :  { %449 = vmatpush3.msra.mxu0 %v89_v13  ;;  %484 = vmatpush3.msra.mxu1 %v183_v18  ;;  %v381_v55 = vld [vmem:[%s796_s4] ss:$0 sm:$0xff] }
  0x45   :  { %450 = vmatprep.subr.mxu0 %v662_v0  ;;  %485 = vmatprep.subr.mxu1 %v662_v0  ;;  %v382_v60 = vld [vmem:[%s798_s6] ss:$0 sm:$0xff] }
  0x46   :  { %451 = vmatpush3.msra.mxu0 %v88_v15  ;;  %486 = vmatpush3.msra.mxu1 %v182_v20 }
  0x47   :  { %452 = vmatprep.subr.mxu0 %v662_v0  ;;  %487 = vmatprep.subr.mxu1 %v662_v0 }
  0x48   :  { %453 = vmatpush3.msra.mxu0 %v87_v17  ;;  %488 = vmatpush3.msra.mxu1 %v181_v22 }
  0x49   :  { %454 = vmatprep.subr.mxu0 %v662_v0  ;;  %489 = vmatprep.subr.mxu1 %v662_v0 }
  0x4a   :  { %455 = vmatpush3.msra.mxu0 %v86_v19  ;;  %490 = vmatpush3.msra.mxu1 %v180_v24 }
  0x4b   :  { %456 = vmatprep.subr.mxu0 %v662_v0  ;;  %491 = vmatprep.subr.mxu1 %v662_v0 }
  0x4c   :  { %457 = vmatpush3.msra.mxu0 %v85_v21  ;;  %492 = vmatpush3.msra.mxu1 %v179_v26 }
  0x4d   :  { %458 = vmatprep.subr.mxu0 %v662_v0  ;;  %493 = vmatprep.subr.mxu1 %v662_v0 }
  0x4e   :  { %459 = vmatpush3.msra.mxu0 %v84_v23  ;;  %494 = vmatpush3.msra.mxu1 %v178_v28 }
  0x4f   :  { %460 = vmatprep.subr.mxu0 %v662_v0  ;;  %495 = vmatprep.subr.mxu1 %v662_v0 }
  0x50   :  { %461 = vmatpush3.msra.mxu0 %v83_v25  ;;  %496 = vmatpush3.msra.mxu1 %v177_v31 }
  0x51   :  { %462 = vmatprep.subr.mxu0 %v662_v0  ;;  %497 = vmatprep.subr.mxu1 %v662_v0 }
  0x52   :  { %463 = vmatpush3.msra.mxu0 %v82_v27  ;;  %498 = vmatpush3.msra.mxu1 %v176_v32 }
  0x53   :  { %464 = vmatprep.subr.mxu0 %v662_v0  ;;  %499 = vmatprep.subr.mxu1 %v662_v0 }
  0x54   :  { %465 = vmatpush3.msra.mxu0 %v81_v29  ;;  %500 = vmatpush3.msra.mxu1 %v175_v33 }
  0x55   :  { %467 = vmatmul.mubr.f32.vlgmr.msra.gmra.mxu0 %v80_v30  ;;  %504 = vmatprep.subr.mxu0 %v662_v0 }
  0x56   :  { %536 = vmatprep.mubr.msk.f32.mxu0 %vm663_vm0, %v662_v0  ;;  %505 = vmatpush3.msra.mxu0 %v284_v34 }
  0x57   :  { %506 = vmatprep.subr.mxu0 %v662_v0 }
  0x58   :  { %507 = vmatpush3.msra.mxu0 %v283_v35 }
  0x59   :  { %508 = vmatprep.subr.mxu0 %v662_v0 }
  0x5a   :  { %509 = vmatpush3.msra.mxu0 %v282_v36 }
  0x5b   :  { %510 = vmatprep.subr.mxu0 %v662_v0 }
  0x5c   :  { %511 = vmatpush3.msra.mxu0 %v281_v37 }
  0x5d   :  { %512 = vmatprep.subr.mxu0 %v662_v0 }
  0x5e   :  { %513 = vmatpush3.msra.mxu0 %v280_v38 }
  0x5f   :  { %514 = vmatprep.subr.mxu0 %v662_v0 }
  0x60   :  { %515 = vmatpush3.msra.mxu0 %v279_v39 }
  0x61   :  { %516 = vmatprep.subr.mxu0 %v662_v0 }
  0x62   :  { %517 = vmatpush3.msra.mxu0 %v278_v40 }
  0x63   :  { %518 = vmatprep.subr.mxu0 %v662_v0 }
  0x64   :  { %519 = vmatpush3.msra.mxu0 %v277_v41 }
  0x65   :  { %520 = vmatprep.subr.mxu0 %v662_v0 }
  0x66   :  { %521 = vmatpush3.msra.mxu0 %v276_v42 }
  0x67   :  { %522 = vmatprep.subr.mxu0 %v662_v0 }
  0x68   :  { %523 = vmatpush3.msra.mxu0 %v275_v43 }
  0x69   :  { %524 = vmatprep.subr.mxu0 %v662_v0 }
  0x6a   :  { %525 = vmatpush3.msra.mxu0 %v274_v44 }
  0x6b   :  { %526 = vmatprep.subr.mxu0 %v662_v0 }
  0x6c   :  { %527 = vmatpush3.msra.mxu0 %v273_v45 }
  0x6d   :  { %528 = vmatprep.subr.mxu0 %v662_v0 }
  0x6e   :  { %529 = vmatpush3.msra.mxu0 %v272_v46 }
  0x6f   :  { %530 = vmatprep.subr.mxu0 %v662_v0 }
  0x70   :  { %531 = vmatpush3.msra.mxu0 %v271_v52 }
  0x71   :  { %532 = vmatprep.subr.mxu0 %v662_v0 }
  0x72   :  { %533 = vmatpush3.msra.mxu0 %v270_v53 }
  0x73   :  { %534 = vmatprep.subr.mxu0 %v662_v0 }
  0x74   :  { %535 = vmatpush3.msra.mxu0 %v269_v54 }
 0x115   :  { %v170_v48 = vpop.f32.mrf.mxu0 }
 0x116   :  { %v171_v49 = vadd.f32 %v380_v47, %v170_v48 }
 0x117   :  { %v468_v50 = vpop.f32.mrf.mxu0 }
 0x118   :  { %v174_v51 = vmax.f32 %v171_v49, 0.0 }
 0x11a   :  { %502 = vmatmul.mubr.f32.vlgmr.msra.gmra.mxu1 %v174_v51 }
 0x1da   :  { %v264_v56 = vpop.f32.mrf.mxu1 }
 0x1db   :  { %v265_v57 = vadd.f32 %v381_v55, %v264_v56 }
 0x1dc   :  { %v503_v58 = vpop.f32.mrf.mxu1 }
 0x1dd   :  { %v268_v59 = vmax.f32 %v265_v57, 0.0 }
 0x1df   :  { %537 = vmatmul.mubr.f32.vlgmr.msra.gmra.mxu0 %v268_v59 }
 0x29f   :  { %v358_v61 = vpop.f32.mrf.mxu0 }
 0x2a0   :  { %v359_v62 = vadd.f32 %v382_v60, %v358_v61 }
 0x2a1   :  { %v538_v63 = vpop.f32.mrf.mxu0 }
 0x2a2   :  { %362 = vst [vmem:[#allocation10] sm:$0xff] %v359_v62 }
 0x2a3   :  { %639 = shalt.err (!%p636_p10)
}
 0x2a4   :  { %372 = dma.vmem_to_hbm [thread:$0]  %s370_s25, 128, %s799_s7, [#allocation4]  }
 0x2a5   :  { %654 = dma.done.wait [#allocation4], 128  }
 0x2a6   :  { %655 = vsyncadd [#allocation4], 4294967168 }
 0x2a7   :  { %376 = vsyncpa [#allocation3], 1 }
 0x2a8   :  { %377 = vsyncpa [#allocation6], 1 }
 0x2a9   :  { %378 = vsyncpa [#allocation9], 1 }
 0x2aa   :  { %379 = vsyncpa [#allocation4], 1 }

</bundles_post_ra>
